<compile_context>
chip_gen: v7x
topology: tpu7x:2x2x1
jax: 0.10.0
libtpu: 0.0.40
codegen_flags: <defaults>
</compile_context>

<pallas_src>
import functools

import jax
import jax.numpy as jnp
from jax.experimental import pallas as pl
from jax.experimental.pallas import tpu as pltpu


def _round_up(v, m):
    return -(-v // m) * m


def _pick_tile_l(l_pad, c_in_p, c_out, k, budget_bytes=20 * 1024 * 1024):
    """Largest lane-friendly tile (multiple of 128 dividing l_pad) under a VMEM budget."""
    for t in (2048, 1024, 512, 256, 128):
        if l_pad % t:
            continue
        est = (2 * c_in_p * t * 4          # double-buffered x tile (f32)
               + 2 * c_out * t * 4         # double-buffered out tile (f32)
               + k * c_in_p * t * 2)       # bf16 im2col scratch
        if est <= budget_bytes:
            return t
    return 128                             # always divides l_pad


def conv1d_lrelu_kernel(*refs, kernel_size, c_in_p, pad, tile_l, alpha):
    # refs (pad > 0):  x_ref, halo_ref, w_ref, b_ref, o_ref, col_ref
    # refs (pad == 0): x_ref,           w_ref, b_ref, o_ref, col_ref
    #
    # x_ref    : (c_in_p, tile_l)        f32 current length tile (batch squeezed)
    # halo_ref : (n_l, c_in_p, 2*pad)    f32 per-batch halo slab (all L tiles)
    # w_ref    : (c_out, K*c_in_p)       bf16 weights, tap-major flattening
    # b_ref    : (c_out, 1)              f32 bias
    # o_ref    : (c_out, tile_l)         output tile (batch squeezed)
    # col_ref  : (K*c_in_p, tile_l)      bf16 im2col scratch (VMEM)
    if pad > 0:
        x_ref, halo_ref, w_ref, b_ref, o_ref, col_ref = refs
        halo = halo_ref[pl.program_id(1)]          # (c_in_p, 2*pad), f32
    else:
        x_ref, w_ref, b_ref, o_ref, col_ref = refs
        halo = None

    x = x_ref[...]                                 # (c_in_p, tile_l), f32

    # im2col: per tap, one XLU lane-roll + one sublane-aligned full-width bf16
    # store; only the `pad` wrapped boundary lanes get a narrow patch store
    # from the halo.  No `win` concatenate is ever materialized.
    for t in range(kernel_size):
        shift = pad - t                            # static Python int
        rows = pl.ds(t * c_in_p, c_in_p)           # 16-aligned sublane offset
        rolled = x if shift == 0 else pltpu.roll(x, shift=shift % tile_l, axis=1)
        col_ref[rows, :] = rolled.astype(jnp.bfloat16)
        if shift > 0:      # left tap: first `shift` lanes come from the left halo
            col_ref[rows, pl.ds(0, shift)] = halo[:, t:pad].astype(jnp.bfloat16)
        elif shift < 0:    # right tap: last `-shift` lanes come from the right halo
            col_ref[rows, pl.ds(tile_l + shift, -shift)] = (
                halo[:, pad:pad - shift].astype(jnp.bfloat16))

    # Single MXU matmul over the (K*C_in_p)-deep contraction (bf16 x bf16 with
    # f32 accumulation); bias + LeakyReLU fused in the same epilogue pass.
    # TODO(synk): on v7x, K per-tap dots accumulated in the MRB would avoid the
    # im2col scratch entirely; the fused single-dot path is kept for portability.
    acc = jnp.dot(w_ref[...], col_ref[...], preferred_element_type=jnp.float32)
    acc = acc + b_ref[...]
    o_ref[...] = jnp.where(acc >= 0.0, acc, alpha * acc).astype(o_ref.dtype)


def conv_layer_with_act(x, weight, bias, *, alpha):
    """x: (N, C_in, L); weight: (C_out, C_in, K); bias: (C_out,)."""
    n, c_in, length = x.shape
    c_out, c_in_w, k = weight.shape
    assert c_in_w == c_in
    assert k % 2 == 1, "kernel_size must be odd for 'same'-padding semantics"
    pad = k // 2

    # Channel pad to a multiple of 16 -> aligned bf16 tap blocks in the im2col
    # scratch; length pad to a multiple of 128 -> lane-dense tiles/stores.
    c_in_p = _round_up(c_in, 16)
    l_pad = _round_up(length, 128)
    tile_l = _pick_tile_l(l_pad, c_in_p, c_out, k)
    n_l = l_pad // tile_l
    assert pad < tile_l

    xp = x
    if c_in_p != c_in or l_pad != length:
        xp = jnp.pad(x, ((0, 0), (0, c_in_p - c_in), (0, l_pad - length)))

    # Weights pre-laid-out for the im2col matmul: (C_out, K*C_in_p), tap-major,
    # zero columns for padded channels, cast to bf16 for the MXU.
    wp = jnp.pad(weight, ((0, 0), (0, c_in_p - c_in), (0, 0)))
    w_col = jnp.transpose(wp, (0, 2, 1)).reshape(c_out, k * c_in_p)
    w_col = w_col.astype(jnp.bfloat16)
    b2 = bias.reshape(c_out, 1).astype(jnp.float32)

    kernel = functools.partial(
        conv1d_lrelu_kernel, kernel_size=k, c_in_p=c_in_p, pad=pad,
        tile_l=tile_l, alpha=float(alpha))

    in_specs = [pl.BlockSpec((None, c_in_p, tile_l), lambda i, j: (i, 0, j))]
    inputs = [xp]
    if pad > 0:
        # Tiny per-tile halo columns (left pad | right pad), zeros at the
        # sequence boundaries -> no full HBM re-pad of x.
        hp = 2 * pad
        xr = xp.reshape(n, c_in_p, n_l, tile_l)
        zero = jnp.zeros((n, c_in_p, 1, pad), xp.dtype)
        left = jnp.concatenate([zero, xr[:, :, :-1, tile_l - pad:]], axis=2)
        right = jnp.concatenate([xr[:, :, 1:, :pad], zero], axis=2)
        halo = jnp.transpose(jnp.concatenate([left, right], axis=3),
                             (0, 2, 1, 3))          # (N, n_L, C_in_p, 2*pad)
        # Whole per-batch halo slab as one block -> DMA'd once per batch only.
        in_specs.append(
            pl.BlockSpec((None, n_l, c_in_p, hp), lambda i, j: (i, 0, 0, 0)))
        inputs.append(halo)
    in_specs += [
        pl.BlockSpec((c_out, k * c_in_p), lambda i, j: (0, 0)),
        pl.BlockSpec((c_out, 1), lambda i, j: (0, 0)),
    ]
    inputs += [w_col, b2]

    out = pl.pallas_call(
        kernel,
        out_shape=jax.ShapeDtypeStruct((n, c_out, l_pad), x.dtype),
        grid=(n, n_l),
        in_specs=in_specs,
        out_specs=pl.BlockSpec((None, c_out, tile_l), lambda i, j: (i, 0, j)),
        scratch_shapes=[pltpu.VMEM((k * c_in_p, tile_l), jnp.bfloat16)],
        compiler_params=pltpu.CompilerParams(
            dimension_semantics=("parallel", "parallel"),
            vmem_limit_bytes=32 * 1024 * 1024,
        ),
    )(*inputs)

    if l_pad != length:
        out = out[:, :, :length]
    return out


def _reference(x, weight, bias, alpha):
    # Pure-JAX reference (NCL conv1d, stride 1, same pad) + LeakyReLU.
    out = jax.lax.conv_general_dilated(
        x, weight,
        window_strides=(1,),
        padding="SAME",
        dimension_numbers=("NCH", "OIH", "NCH"),
    ) + bias.reshape(1, -1, 1)
    return jnp.where(out >= 0.0, out, alpha * out)


if __name__ == "__main__":
    # Small shapes consistent with the module: batch=2, C_in=4, C_out=8, L=16, K=3
    N, C_IN, C_OUT, L, K = 2, 4, 8, 16, 3
    ACT_PARAM = 0.2  # cfg.act_param for LeakyReLU

    key = jax.random.PRNGKey(0)
    kx, kw, kb = jax.random.split(key, 3)
    x = jax.random.normal(kx, (N, C_IN, L), dtype=jnp.float32)
    # Deterministic parameter init (PyTorch-like uniform bound 1/sqrt(fan_in)).
    bound = 1.0 / (C_IN * K) ** 0.5
    weight = jax.random.uniform(kw, (C_OUT, C_IN, K), jnp.float32, -bound, bound)
    bias = jax.random.uniform(kb, (C_OUT,), jnp.float32, -bound, bound)

    out = conv_layer_with_act(x, weight, bias, alpha=ACT_PARAM)
    out = jax.block_until_ready(out)
    assert out.shape == (N, C_OUT, L)

    # The kernel feeds the MXU bf16 operands (f32 accumulation), so compare
    # tightly against an f32 reference evaluated on bf16-rounded inputs, and
    # loosely against the pure-f32 reference as a sanity bound.
    x_bf = x.astype(jnp.bfloat16).astype(jnp.float32)
    w_bf = weight.astype(jnp.bfloat16).astype(jnp.float32)
    ref_bf16 = _reference(x_bf, w_bf, bias, ACT_PARAM)
    ref_f32 = _reference(x, weight, bias, ACT_PARAM)
    assert jnp.allclose(out, ref_bf16, atol=2e-3, rtol=2e-3)
    assert jnp.allclose(out, ref_f32, atol=1e-1, rtol=1e-1)

    print("KERNEL_OK")
</pallas_src>

<mosaic_0001>
module attributes {stable_mosaic.version = 11 : i64} {
  func.func @conv1d_lrelu_kernel(%arg0: i32, %arg1: i32, %arg2: memref<1x16x128xf32, #tpu.memory_space<vmem>>, %arg3: memref<1x1x16x2xf32, #tpu.memory_space<vmem>>, %arg4: memref<8x48xbf16, #tpu.memory_space<vmem>>, %arg5: memref<8x1xf32, #tpu.memory_space<vmem>>, %arg6: memref<1x8x128xf32, #tpu.memory_space<vmem>>, %arg7: memref<48x128xbf16, #tpu.memory_space<vmem>>) attributes {dimension_semantics = [#tpu.dimension_semantics<parallel>, #tpu.dimension_semantics<parallel>], iteration_bounds = array<i64: 2, 1>, scalar_prefetch = 0 : i64, scratch_operands = 1 : i64, tpu.core_type = #tpu.core_type<tc>, window_params = [{transform_indices = @transform_0, window_bounds = array<i64: 1, 16, 128>}, {transform_indices = @transform_1, window_bounds = array<i64: 1, 1, 16, 2>}, {pipeline_mode = #tpu.pipeline_mode<synchronous>, transform_indices = @transform_2, window_bounds = array<i64: 8, 48>}, {pipeline_mode = #tpu.pipeline_mode<synchronous>, transform_indices = @transform_3, window_bounds = array<i64: 8, 1>}, {transform_indices = @transform_4, window_bounds = array<i64: 1, 8, 128>}]} {
    %c0 = arith.constant 0 : index
    %0 = arith.index_cast %arg1 : i32 to index
    %c0_0 = arith.constant 0 : index
    %c0_1 = arith.constant 0 : index
    %1 = vector.load %arg3[%c0, %0, %c0_0, %c0_1] : memref<1x1x16x2xf32, #tpu.memory_space<vmem>>, vector<1x1x16x2xf32>
    %2 = vector.shape_cast %1 : vector<1x1x16x2xf32> to vector<16x2xf32>
    %c0_2 = arith.constant 0 : index
    %c0_3 = arith.constant 0 : index
    %c0_4 = arith.constant 0 : index
    %3 = vector.load %arg2[%c0_2, %c0_3, %c0_4] : memref<1x16x128xf32, #tpu.memory_space<vmem>>, vector<1x16x128xf32>
    %4 = vector.shape_cast %3 : vector<1x16x128xf32> to vector<16x128xf32>
    %c1_i32 = arith.constant 1 : i32
    %5 = tpu.dynamic_rotate %4 by %c1_i32 dim 1 : vector<16x128xf32>, i32 -> vector<16x128xf32>
    %6 = arith.truncf %5 : vector<16x128xf32> to vector<16x128xbf16>
    %c0_5 = arith.constant 0 : index
    %c0_6 = arith.constant 0 : index
    %7 = vector.load %arg7[%c0_5, %c0_6] : memref<48x128xbf16, #tpu.memory_space<vmem>>, vector<16x128xbf16>
    tpu.vector_store %arg7[%c0_5, %c0_6], %6 {strides = array<i32>} : memref<48x128xbf16, #tpu.memory_space<vmem>>, vector<16x128xbf16>,
    %8 = vector.extract_strided_slice %2 {offsets = [0, 0], sizes = [16, 1], strides = [1, 1]} : vector<16x2xf32> to vector<16x1xf32>
    %9 = arith.truncf %8 : vector<16x1xf32> to vector<16x1xbf16>
    %c0_7 = arith.constant 0 : index
    %c0_8 = arith.constant 0 : index
    %10 = vector.load %arg7[%c0_7, %c0_8] : memref<48x128xbf16, #tpu.memory_space<vmem>>, vector<16x1xbf16>
    tpu.vector_store %arg7[%c0_7, %c0_8], %9 {strides = array<i32>} : memref<48x128xbf16, #tpu.memory_space<vmem>>, vector<16x1xbf16>,
    %11 = arith.truncf %4 : vector<16x128xf32> to vector<16x128xbf16>
    %c16 = arith.constant 16 : index
    %c0_9 = arith.constant 0 : index
    %12 = vector.load %arg7[%c16, %c0_9] : memref<48x128xbf16, #tpu.memory_space<vmem>>, vector<16x128xbf16>
    tpu.vector_store %arg7[%c16, %c0_9], %11 {strides = array<i32>} : memref<48x128xbf16, #tpu.memory_space<vmem>>, vector<16x128xbf16>,
    %c127_i32 = arith.constant 127 : i32
    %13 = tpu.dynamic_rotate %4 by %c127_i32 dim 1 : vector<16x128xf32>, i32 -> vector<16x128xf32>
    %14 = arith.truncf %13 : vector<16x128xf32> to vector<16x128xbf16>
    %c32 = arith.constant 32 : index
    %c0_10 = arith.constant 0 : index
    %15 = vector.load %arg7[%c32, %c0_10] : memref<48x128xbf16, #tpu.memory_space<vmem>>, vector<16x128xbf16>
    tpu.vector_store %arg7[%c32, %c0_10], %14 {strides = array<i32>} : memref<48x128xbf16, #tpu.memory_space<vmem>>, vector<16x128xbf16>,
    %16 = vector.extract_strided_slice %2 {offsets = [0, 1], sizes = [16, 1], strides = [1, 1]} : vector<16x2xf32> to vector<16x1xf32>
    %17 = arith.truncf %16 : vector<16x1xf32> to vector<16x1xbf16>
    %c32_11 = arith.constant 32 : index
    %c127 = arith.constant 127 : index
    %18 = vector.load %arg7[%c32_11, %c127] : memref<48x128xbf16, #tpu.memory_space<vmem>>, vector<16x1xbf16>
    tpu.vector_store %arg7[%c32_11, %c127], %17 {strides = array<i32>} : memref<48x128xbf16, #tpu.memory_space<vmem>>, vector<16x1xbf16>,
    %c0_12 = arith.constant 0 : index
    %c0_13 = arith.constant 0 : index
    %19 = vector.load %arg4[%c0_12, %c0_13] : memref<8x48xbf16, #tpu.memory_space<vmem>>, vector<8x48xbf16>
    %c0_14 = arith.constant 0 : index
    %c0_15 = arith.constant 0 : index
    %20 = vector.load %arg7[%c0_14, %c0_15] : memref<48x128xbf16, #tpu.memory_space<vmem>>, vector<48x128xbf16>
    %cst = arith.constant dense<0.000000e+00> : vector<8x128xf32>
    %21 = tpu.matmul %19, %20, %cst {dimension_numbers = #tpu.dot_dimension_numbers<[1], [0], [0], [1], [0, 0, 1, 1], [], []>} : vector<8x48xbf16>, vector<48x128xbf16>, vector<8x128xf32> -> vector<8x128xf32>
    %c0_16 = arith.constant 0 : index
    %c0_17 = arith.constant 0 : index
    %22 = vector.load %arg5[%c0_16, %c0_17] : memref<8x1xf32, #tpu.memory_space<vmem>>, vector<8x1xf32>
    %23 = vector.broadcast %22 : vector<8x1xf32> to vector<8x128xf32>
    %24 = arith.addf %21, %23 : vector<8x128xf32>
    %cst_18 = arith.constant 0.000000e+00 : f32
    %25 = vector.broadcast %cst_18 : f32 to vector<8x128xf32>
    %26 = arith.cmpf oge, %24, %25 : vector<8x128xf32>
    %cst_19 = arith.constant 2.000000e-01 : f32
    %27 = vector.broadcast %cst_19 : f32 to vector<8x128xf32>
    %28 = arith.mulf %27, %24 : vector<8x128xf32>
    %29 = arith.select %26, %24, %28 : vector<8x128xi1>, vector<8x128xf32>
    %c0_20 = arith.constant 0 : index
    %c0_21 = arith.constant 0 : index
    %c0_22 = arith.constant 0 : index
    %30 = vector.load %arg6[%c0_20, %c0_21, %c0_22] : memref<1x8x128xf32, #tpu.memory_space<vmem>>, vector<1x8x128xf32>
    %31 = vector.shape_cast %30 : vector<1x8x128xf32> to vector<8x128xf32>
    %32 = vector.shape_cast %29 : vector<8x128xf32> to vector<1x8x128xf32>
    tpu.vector_store %arg6[%c0_20, %c0_21, %c0_22], %32 {strides = array<i32>} : memref<1x8x128xf32, #tpu.memory_space<vmem>>, vector<1x8x128xf32>,
    return
  }
  func.func @transform_0(%arg0: i32, %arg1: i32) -> (i32, i32, i32) {
    %c0_i32 = arith.constant 0 : i32
    %c0_i32_0 = arith.constant 0 : i32
    return %arg0, %c0_i32, %arg1 : i32, i32, i32
  }
  func.func @transform_1(%arg0: i32, %arg1: i32) -> (i32, i32, i32, i32) {
    %c0_i32 = arith.constant 0 : i32
    %c0_i32_0 = arith.constant 0 : i32
    %c0_i32_1 = arith.constant 0 : i32
    %c0_i32_2 = arith.constant 0 : i32
    return %arg0, %c0_i32, %c0_i32_0, %c0_i32_1 : i32, i32, i32, i32
  }
  func.func @transform_2(%arg0: i32, %arg1: i32) -> (i32, i32) {
    %c0_i32 = arith.constant 0 : i32
    %c0_i32_0 = arith.constant 0 : i32
    %c0_i32_1 = arith.constant 0 : i32
    return %c0_i32, %c0_i32_0 : i32, i32
  }
  func.func @transform_3(%arg0: i32, %arg1: i32) -> (i32, i32) {
    %c0_i32 = arith.constant 0 : i32
    %c0_i32_0 = arith.constant 0 : i32
    %c0_i32_1 = arith.constant 0 : i32
    return %c0_i32, %c0_i32_0 : i32, i32
  }
  func.func @transform_4(%arg0: i32, %arg1: i32) -> (i32, i32, i32) {
    %c0_i32 = arith.constant 0 : i32
    %c0_i32_0 = arith.constant 0 : i32
    return %arg0, %c0_i32, %arg1 : i32, i32, i32
  }
}

</mosaic_0001>

<bundles_post_ra>
// kernel: tpu_custom_call.1
= control target key start
LH: loop header
LB: loop body
LE: loop exit
PB: predicated region body
PF: predicated region fallthrough
CT: control target
= control target key end

     0   :  { %9 = vsyncpa [#allocation4], 0  ;;  %s769_s0 = inlined_call_operand.vmem [shape: f32[2,16,128], index: 0, kind: input, shape index: {}]   ;;  %s770_s1 = inlined_call_operand.vmem [shape: f32[2,1,16,2], index: 1, kind: input, shape index: {}]   ;;  %s771_s2 = inlined_call_operand.vmem [shape: bf16[8,48], index: 2, kind: input, shape index: {}]   ;;  %s772_s3 = inlined_call_operand.vmem [shape: f32[8,1], index: 3, kind: input, shape index: {}]   ;;  %s773_s4 = inlined_call_operand.hbm [shape: f32[2,8,128], index: 4, kind: output, shape index: {}]  }
   0x1   :  { %11 = vsyncpa [#allocation4 + $0x1], 0  ;;  %s648_s15 = smov 0   ;;  %s650_s16 = smov 0  }
   0x2   :  { %s652_s17 = smov 0   ;;  %s654_s18 = smov 0  }
   0x3   :  { %s656_s19 = smov 0   ;;  %s658_s20 = smov 0  }
   0x4 LB: > { %s432_s21 = sadd.s32 4294967295, %s614_s20   ;;  %s433_s22 = sadd.s32 4294967294, %s614_s20   ;;  %s614_s20 = sphi %s658_s20, %s17_s20   ;;  %s610_s19 = sphi %s656_s19, %s780_s19   ;;  %s606_s18 = sphi %s654_s18, %s779_s18   ;;  %s602_s17 = sphi %s652_s17, %s778_s17   ;;  %s598_s16 = sphi %s650_s16, %s777_s16   ;;  %s594_s15 = sphi %s648_s15, %s776_s15  }
   0x5   : > { %s29_s23 = sadd.s32 1, %s610_s19  ;;  %s134_s24 = sadd.s32 1, %s602_s17 }
   0x6   : > { %p31_p0 = scmp.ge.s32.totalorder %s29_s23, 2  ;;  %p144_p1 = scmp.ne.s32.totalorder %s602_s17, %s598_s16 }
   0x7   : > { %p145_p2 = scmp.eq.s32.totalorder %s432_s21, 1  ;;  %p150_p3 = scmp.ne.s32.totalorder %s598_s16, %s594_s15 }
   0x8   : > { %s782_s23 = smov (%p31_p0, %s29_s23), 0  ;;  %p151_p5 = scmp.eq.s32.totalorder %s433_s22, 1 }
   0x9   : > { %p688_p4 = por %p145_p2, %p144_p1  ;;  %s129_s26 = ssub.s32 %s610_s19, %s782_s23 }
   0xa   : > { %p436_p6 = scmp.ge.s32.totalorder %s614_s20, 1  ;;  %p132_p7 = scmp.eq.s32.totalorder %s129_s26, 0 }
   0xb   : > { %p695_p8 = por %p151_p5, %p150_p3  ;;  %p194_p9 = scmp.lt.s32.totalorder %s614_s20, 3 }
   0xc   : > { %s701_s28 = scalar_select %p132_p7, %s602_s17, %s134_s24  }
   0xd   : > { %p195_p10 = pnand %p436_p6, %p194_p9 }
   0xe   : > { %p228_p11 = scmp.lt.s32.totalorder (!%p195_p10), %s606_s18, 1  ;;  %v616_v0 = vmov (!%p195_p10), 0.0   ;;  %s617_s11 = smov (!%p195_p10), 1   ;;  %vm620_vm0 = vmmov (!%p195_p10), 0   ;;  %v275_v8 = vld [vmem:[%s772_s3] sm:$0xff] (!%p195_p10)  ;;  %v621_v9 = vmov (!%p195_p10), 0  }
   0xf   : > { %198 = sbr.rel (%p195_p10) target bundleno = 399 (0x18f), region = 36  ;;  %453 = vmatprep.subr.bf16.mxu0 (!%p195_p10), %v616_v0  ;;  %s618_s12 = smov (!%p195_p10), 126   ;;  %459 = vmatprep.mubr.msk.bf16.mxu0 (!%p195_p10), %vm620_vm0, %v616_v0  ;;  %vm255_vm1 = vcmask (!%p195_p10), 7168   ;;  %vm269_vm2 = vcmask (!%p195_p10), 1048568   ;;  %v271_v21 = vld [vmem:[%s771_s2] sm:$0xf] (!%p195_p10) }
  0x10   : > { %s619_s13 = smov (!%p195_p10), 127   ;;  %534 = vset.pattern.permute.xlu1 (!%p195_p10), %v621_v9  ;;  %535 = vset.pattern.permute.xlu0 (!%p195_p10), %v621_v9  ;;  %vm281_vm3 = vcmask (!%p195_p10), 392192   ;;  %s225_s26 = sand.u32 (!%p195_p10), 1, %s598_s16  }
  0x16   : > { %s229_s29 = scalar_select %p228_p11, %s606_s18, 1 }
  0x18   : > { %s447_s30 = sshll.u32 %s229_s29, 4  ;;  %s437_s29 = sshll.u32 %s225_s26, 3 }
  0x19   : > { %s235_s7 = scalar_lea.vmem %s769_s0, %s447_s30  ;;  %s240_s10 = scalar_lea.vmem %s770_s1, %s447_s30 }
  0x1a   : > { %v246_v1 = vld [vmem:[%s235_s7] sm:$0xff]  ;;  %v247_v2 = vld [vmem:[%s235_s7 + $0x8] sm:$0xff]  ;;  %s444_s30 = sshll.u32 %s606_s18, 7  ;;  %s227_s5 = scalar_lea.vmem [#allocation3], %s437_s29 }
  0x1b   : > { %v244_v3 = vld [vmem:[%s240_s10] sm:$0xff]  ;;  %v524_v4 = vpack.i.bf16 %v247_v2, %v246_v1  ;;  %v257_v5 = vpack.c.bf16 %v247_v2, %v246_v1  ;;  %v245_v6 = vld [vmem:[%s240_s10 + $0x8] sm:$0xff]  ;;  %s344_s6 = sshll.u32 %s227_s5, 4  ;;  %s722_s9 = scalar_lea.hbm %s773_s4, %s444_s30  ;;  %s724_s6 = int_to_ptr.vmem [resolvable:$true] %s344_s6 }
  0x1c   : > { %v254_v7 = vpack.c.bf16 %v245_v6, %v244_v3  ;;  %s330_s10 = scalar_lea.sflag [#allocation4], %s225_s26  ;;  %s536_s18 = scalar_lea.vmem %s724_s6, 128 }
  0x1d   : > { %525 = vrot.lane.b32.xlu0 %v524_v4, %s617_s11  ;;  %p537_p12 = scmp.ne.s32.totalorder %s724_s6, %s536_s18  ;;  %s622_s11 = smov [#allocation3]  }
  0x1e   : > { %266 = vrot.lane.b32.xlu1 %v254_v7, %s618_s12  ;;  %s540_s12 = sshll.u32 %s622_s11, 4  ;;  %s541_s12 = int_to_ptr.vmem [resolvable:$false] %s540_s12 }
  0x1f   : > { %p538_p13 = pnand %p537_p12, %p688_p4  ;;  %p543_p1 = scmp.lt.s32.totalorder %s724_s6, %s541_s12 }
  0x21   : > { %530 = vrot.lane.b32.xlu0 %v524_v4, %s619_s13  ;;  %p539_p0 = pneg %p538_p13  ;;  %s542_s13 = scalar_lea.vmem %s541_s12, 256 }
  0x22   : > { %278 = vperm.xlu1 %534, %v275_v8   ;;  %p544_p2 = scmp.lt.s32.totalorder %s542_s13, %s536_s18 }
  0x24   : > { %p545_p3 = por %p544_p2, %p543_p1 }
  0x26   : > { %p546_p5 = pnand %p545_p3, %p539_p0 }
  0x8f   : > { %v526_v10 = vpop.permute.xlu0 %525 }
  0x90   : > { %v528_v11 = vunpack.i.h.bf16 %v526_v10  ;;  %v527_v12 = vunpack.i.l.bf16 %v526_v10  ;;  %v267_v18 = vpop.permute.xlu1 %266 }
  0x92   : > { %v252_v13 = vpack.c.bf16 %v528_v11, %v527_v12 }
  0x93   : > { %v531_v14 = vpop.permute.xlu0 %530 }
  0x94   : > { %253 = vst [vmem:[#allocation2] sm:$0xff] %v252_v13  ;;  %v533_v15 = vunpack.i.h.bf16 %v531_v14  ;;  %v532_v16 = vunpack.i.l.bf16 %v531_v14 }
  0x95   : > { %256 = vst.msk [vmem:[#allocation2] sm:$0xff] %vm255_vm1, %v254_v7 }
  0x96   : > { %v263_v17 = vpack.c.bf16 %v533_v15, %v532_v16 }
  0x98   : > { %264 = vst [vmem:[#allocation2 + $0x10] sm:$0xff] %v263_v17 }
  0x99   : > { %270 = vst.msk [vmem:[#allocation2 + $0x10] sm:$0xff] %vm269_vm2, %v267_v18 }
  0x9c   : > { %v272_v19 = vld [vmem:[#allocation2] sm:$0xff] }
  0x9d   : > { %454 = vmatpush3.bf16.msra.mxu0 %v272_v19 }
  0x9e   : > { %455 = vmatprep.subr.bf16.mxu0 %v616_v0 }
  0xa0   : > { %v274_v20 = vld [vmem:[#allocation2 + $0x10] sm:$0xff] }
  0xa1   : > { %456 = vmatpush3.bf16.msra.mxu0 %v257_v5  ;;  %v279_v22 = vpop.permute.xlu1 %278 }
  0xa2   : > { %457 = vmatprep.subr.bf16.mxu0 %v616_v0 }
  0xa5   : > { %458 = vmatpush3.bf16.msra.mxu0 %v274_v20 }
  0xa8   : > { %460 = vmatmul.mubr.msk.bf16.vlgmr.msra.gmra.mrb[0].mxu0 %vm281_vm3, %v271_v21 }
 0x17b   : > { %v319_v23 = vpop.f32.mrb[0].mxu0 }
 0x17c   : > { %v320_v24 = vadd.f32 %v319_v23, %v279_v22  ;;  %v461_v25 = vpop.f32.mrb[1].mxu0 }
 0x17d   : > { %v322_v26 = vpop.f32.mrb[2].mxu0 }
 0x17e   : > { %vm325_vm4 = vcmp.ge.f32.partialorder %v320_v24, 0.0  ;;  %v326_v27 = vmul.f32 0.2, %v320_v24  ;;  %v462_v28 = vpop.f32.mrb[3].mxu0 }
 0x180   : > { %v327_v29 = vsel %vm325_vm4, %v320_v24, %v326_v27 }
 0x181   : > { %328 = vst [vmem:[%s227_s5] sm:$0xff] %v327_v29 }
 0x182   : > { %549 = shalt.err (!%p546_p5)
}
 0x183   : > { %s550_s14 = scalar_lea.hbm %s722_s9, 128  ;;  %s554_s24 = scalar_lea.hbm %s773_s4, 256 }
 0x184   : > { %p551_p6 = scmp.ne.s32.totalorder %s722_s9, %s550_s14  ;;  %p555_p10 = scmp.lt.u32.totalorder %s722_s9, %s773_s4 }
 0x185   : > { %p556_p11 = scmp.lt.u32.totalorder %s554_s24, %s550_s14  ;;  %p558_p13 = scmp.lt.u32.totalorder %s550_s14, %s722_s9 }
 0x186   : > { %p552_p7 = pnand %p551_p6, %p688_p4 }
 0x187   : > { %p557_p12 = por %p556_p11, %p555_p10 }
 0x188   : > { %p553_p9 = pneg %p552_p7 }
 0x189   : > { %p559_p0 = por %p558_p13, %p557_p12 }
 0x18b   : > { %p560_p1 = pnand %p559_p0, %p553_p9 }
 0x18d   : > { %563 = shalt.err (!%p560_p1)
}
 0x18e   : > { %463 = dma.vmem_to_hbm [thread:$0]  (%p688_p4), %s724_s6, 128, %s722_s9, %s330_s10  }
 0x18f PF: > { %p469_p2 = scmp.ge.s32.totalorder %s614_s20, 2  ;;  %s356_s30 = sand.u32 1, %s594_s15  }
 0x190   : > { %s357_s5 = scalar_lea.sflag [#allocation4], %s356_s30 }
 0x191   : > { %p466_p3 = pnand %p469_p2, %p695_p8 }
 0x193   : > { %589 = dma.done.wait (!%p466_p3), %s357_s5, 128  }
 0x194   : > { %591 = vsyncadd (!%p466_p3), %s357_s5, 4294967168  ;;  %s17_s20 = sadd.s32 1, %s614_s20   ;;  %s776_s15 = smov %s598_s16 }
 0x195   : > { %p14_p5 = scmp.ge.s32.totalorder %s17_s20, 4   ;;  %s777_s16 = smov %s602_s17 }
 0x196   : > { %s778_s17 = smov %s701_s28  ;;  %s779_s18 = smov %s610_s19 }
 0x197   : > { %s780_s19 = smov %s782_s23  ;;  %16 = sbr.rel (!%p14_p5) target bundleno = 4 (0x4), region = 75 }
 0x19e   :  { %362 = vsyncpa [#allocation4], 1 }
 0x19f   :  { %364 = vsyncpa [#allocation4 + $0x1], 1 }

</bundles_post_ra>
